<compile_context>
chip_gen: v7x
topology: tpu7x:2x2x1
jax: 0.10.0
libtpu: 0.0.40
codegen_flags: <defaults>
</compile_context>

<pallas_src>
import math

import jax
import jax.numpy as jnp
from jax.experimental import pallas as pl
from jax.experimental.pallas import tpu as pltpu


_LANE = 128


def _pos_add_kernel(x_ref, pos_ref, o_ref):
    # Elementwise add on the VPU; jnp promotion inside the kernel matches
    # PyTorch type promotion, then cast to the declared output dtype.
    o_ref[...] = (x_ref[...] + pos_ref[...]).astype(o_ref.dtype)


def _round_down(v, m):
    return (v // m) * m


def _round_up(v, m):
    return ((v + m - 1) // m) * m


def _tpu_vmem_capacity_bytes():
    try:
        return int(pltpu.get_tpu_info().vmem_capacity_bytes)
    except Exception:
        # Conservative default (v7x per-TC VMEM) if the query is unavailable.
        return 64 << 20


def _sublane_multiple(*dtypes):
    # Packed-sublane multiple of the narrowest dtype: f32 -> 8, bf16 -> 16, 8-bit -> 32.
    min_item = min(jnp.dtype(d).itemsize for d in dtypes)
    return 8 * max(1, 4 // max(1, min_item))


def _vmem_limit(block_elems, dtypes, vmem_capacity):
    # 2x (double-buffer) each of x / pos / out blocks, plus headroom; never
    # below the computed need, never above ~70% of physical VMEM.
    per_elem = sum(jnp.dtype(d).itemsize for d in dtypes)
    needed = 2 * block_elems * per_elem + (4 << 20)
    cap = int(0.7 * vmem_capacity)
    limit = min(max(needed, 32 << 20), cap)
    return int(max(limit, needed))


def _forward_lane_dense(x_r, pos_r, out_dtype, target_block_bytes, vmem_capacity):
    """x_r: (B, R, 128), pos_r: (1, R_pos, 128) with R_pos >= R. Returns (B, R, 128)."""
    B, R, _ = x_r.shape
    itemsize = max(jnp.dtype(x_r.dtype).itemsize,
                   jnp.dtype(pos_r.dtype).itemsize,
                   jnp.dtype(out_dtype).itemsize)
    sub = _sublane_multiple(x_r.dtype, pos_r.dtype, out_dtype)

    if R < sub:
        # Tiny row count: single block equal to the full array dims (satisfies
        # the (8,128) rule).  Slice pos to exactly R rows so its block also
        # equals its full dims (few-KiB cost at most, only on tiny problems).
        if pos_r.shape[1] != R:
            pos_r = pos_r[:, :R, :]
        TR = R
        num_tiles = 1
    else:
        # Balanced tiling: every tile near-equal, no near-empty trailing tile.
        tr_target = max(sub, _round_down(target_block_bytes // (_LANE * itemsize), sub))
        num_tiles = pl.cdiv(R, tr_target)
        if B == 1 and num_tiles == 1 and R >= 2 * sub:
            num_tiles = 2      # keep both v7x TensorCores busy
        TR = min(_round_up(pl.cdiv(R, num_tiles), sub), _round_down(R, sub))
        TR = max(TR, sub)
        num_tiles = pl.cdiv(R, TR)

    grid = (num_tiles, B)       # rows outer, batch inner -> pos stays resident
    blk = (1, TR, _LANE)

    return pl.pallas_call(
        _pos_add_kernel,
        out_shape=jax.ShapeDtypeStruct((B, R, _LANE), out_dtype),
        grid_spec=pltpu.PrefetchScalarGridSpec(
            num_scalar_prefetch=0,
            grid=grid,
            in_specs=[
                pl.BlockSpec(blk, lambda r, b: (b, r, 0)),
                # Batch-invariant block index: pipeline skips re-fetching pos
                # across the inner batch loop.
                pl.BlockSpec(blk, lambda r, b: (0, r, 0)),
            ],
            out_specs=pl.BlockSpec(blk, lambda r, b: (b, r, 0)),
        ),
        compiler_params=pltpu.CompilerParams(
            dimension_semantics=("parallel", "parallel"),
            vmem_limit_bytes=_vmem_limit(
                TR * _LANE, (x_r.dtype, pos_r.dtype, out_dtype), vmem_capacity),
        ),
    )(x_r, pos_r)


def positional_encoding_forward(x, pos_embed, *, out_dtype=None,
                                target_block_bytes=None,
                                small_fallback_bytes=1 << 20):
    """
    x:         [B, N, E]
    pos_embed: [1, max_len, E]  (learnable parameter)
    returns    [B, N, E]  = x + pos_embed[:, :N, :]

    out_dtype:           None -> PyTorch-style promotion (default).  Pass x.dtype
                         (e.g. bf16) to halve write bandwidth if acceptable.
    target_block_bytes:  per-array VMEM tile budget (default ~4 MiB).
    small_fallback_bytes: below this total output size, use plain JAX (fusable,
                         no pallas_call launch overhead).
    """
    B, N, E = x.shape
    p_b, max_len, p_e = pos_embed.shape
    assert p_b == 1 and p_e == E, "pos_embed must have shape (1, max_len, E)"
    assert N <= max_len, "sequence length exceeds max_len of the positional table"

    if out_dtype is None:
        out_dtype = jnp.result_type(x.dtype, pos_embed.dtype)

    total_out_bytes = B * N * E * jnp.dtype(out_dtype).itemsize
    if total_out_bytes < small_fallback_bytes:
        # Tiny problem: launch overhead dwarfs the data movement.
        return (x + pos_embed[:, :N, :]).astype(out_dtype)

    vmem_capacity = _tpu_vmem_capacity_bytes()
    if target_block_bytes is None:
        target_block_bytes = 4 << 20   # good on v5e/v6e/v7x (see header comment)

    if (N * E) % _LANE == 0:
        R = (N * E) // _LANE
        x_r = x.reshape(B, R, _LANE)
        if (max_len * E) % _LANE == 0:
            # :N slice expressed purely via the index_map (grid only covers R rows).
            pos_r = pos_embed.reshape(1, (max_len * E) // _LANE, _LANE)
        else:
            # Misaligned table length: one tiny wrapper slice keeps the lane-dense path.
            pos_r = pos_embed[:, :N, :].reshape(1, R, _LANE)
        out_r = _forward_lane_dense(x_r, pos_r, out_dtype, target_block_bytes, vmem_capacity)
        return out_r.reshape(B, N, E)

    # Misaligned N*E: pad N minimally so the flattened rows are 128-lane aligned,
    # run lane-dense (unmasked stores), then slice back.  Padding is <= 128/gcd(E,128)
    # positions, i.e. negligible extra traffic.
    step = _LANE // math.gcd(E, _LANE)
    n_pad = _round_up(N, step)
    x_p = jnp.pad(x, ((0, 0), (0, n_pad - N), (0, 0)))
    pos_p = jnp.pad(pos_embed[:, :N, :], ((0, 0), (0, n_pad - N), (0, 0)))
    R = (n_pad * E) // _LANE
    out_r = _forward_lane_dense(x_p.reshape(B, R, _LANE),
                                pos_p.reshape(1, R, _LANE),
                                out_dtype, target_block_bytes, vmem_capacity)
    return out_r.reshape(B, n_pad, E)[:, :N, :]


if __name__ == "__main__":
    key = jax.random.PRNGKey(0)
    k1, k2, k3, k4, k5, k6, k7, k8 = jax.random.split(key, 8)

    # Config 1: tiny module-spec shapes (B=2, N=8, E=32, max_len=64).
    # Default dispatch takes the plain-JAX tiny path; also force the Pallas path.
    B, N, E, MAX_LEN = 2, 8, 32, 64
    x = jax.random.normal(k1, (B, N, E), dtype=jnp.float32)
    pos = jax.random.normal(k2, (1, MAX_LEN, E), dtype=jnp.float32) * 0.02
    ref = x + pos[:, :N, :]
    out_a = jax.block_until_ready(positional_encoding_forward(x, pos))
    out_b = jax.block_until_ready(
        positional_encoding_forward(x, pos, small_fallback_bytes=0))
    assert out_a.shape == ref.shape and out_a.dtype == ref.dtype
    assert jnp.allclose(out_a, ref, atol=1e-6, rtol=1e-6)
    assert out_b.shape == ref.shape and out_b.dtype == ref.dtype
    assert jnp.allclose(out_b, ref, atol=1e-6, rtol=1e-6)

    # Config 2: lane-aligned E, mixed precision (bf16 activations, f32 table);
    # exercises the lane-dense Pallas path, dtype-aware sublane rounding, and
    # PyTorch-style promotion (out f32).  Also check the opt-in bf16 output.
    B2, N2, E2, MAX_LEN2 = 2, 64, 128, 256
    x2 = jax.random.normal(k3, (B2, N2, E2), dtype=jnp.float32).astype(jnp.bfloat16)
    pos2 = jax.random.normal(k4, (1, MAX_LEN2, E2), dtype=jnp.float32) * 0.02
    ref2 = x2 + pos2[:, :N2, :]
    out2 = jax.block_until_ready(
        positional_encoding_forward(x2, pos2, small_fallback_bytes=0))
    assert out2.shape == ref2.shape and out2.dtype == ref2.dtype == jnp.float32
    assert jnp.allclose(out2, ref2, atol=1e-6, rtol=1e-6)
    out2_bf16 = jax.block_until_ready(
        positional_encoding_forward(x2, pos2, out_dtype=jnp.bfloat16,
                                    small_fallback_bytes=0))
    assert out2_bf16.dtype == jnp.bfloat16
    assert jnp.allclose(out2_bf16.astype(jnp.float32), ref2, atol=2e-2, rtol=2e-2)

    # Config 3: ViT-ish f32 shapes large enough to take the default Pallas path
    # (balanced multi-row tiling, pos kept resident across the batch loop).
    B3, N3, E3, MAX_LEN3 = 2, 256, 768, 512
    x3 = jax.random.normal(k5, (B3, N3, E3), dtype=jnp.float32)
    pos3 = jax.random.normal(k6, (1, MAX_LEN3, E3), dtype=jnp.float32) * 0.02
    ref3 = x3 + pos3[:, :N3, :]
    out3 = jax.block_until_ready(positional_encoding_forward(x3, pos3))
    assert out3.shape == ref3.shape and out3.dtype == ref3.dtype
    assert jnp.allclose(out3, ref3, atol=1e-6, rtol=1e-6)

    # Config 4: misaligned N*E (E=48, N=10) -> minimal-pad lane-dense path.
    B4, N4, E4, MAX_LEN4 = 2, 10, 48, 20
    x4 = jax.random.normal(k7, (B4, N4, E4), dtype=jnp.float32)
    pos4 = jax.random.normal(k8, (1, MAX_LEN4, E4), dtype=jnp.float32) * 0.02
    ref4 = x4 + pos4[:, :N4, :]
    out4 = jax.block_until_ready(
        positional_encoding_forward(x4, pos4, small_fallback_bytes=0))
    assert out4.shape == ref4.shape and out4.dtype == ref4.dtype
    assert jnp.allclose(out4, ref4, atol=1e-6, rtol=1e-6)

    print("KERNEL_OK")
</pallas_src>

<mosaic_0001>
module attributes {stable_mosaic.version = 11 : i64} {
  func.func @_pos_add_kernel(%arg0: i32, %arg1: i32, %arg2: memref<1x2x128xf32, #tpu.memory_space<vmem>>, %arg3: memref<1x2x128xf32, #tpu.memory_space<vmem>>, %arg4: memref<1x2x128xf32, #tpu.memory_space<vmem>>) attributes {dimension_semantics = [#tpu.dimension_semantics<parallel>, #tpu.dimension_semantics<parallel>], iteration_bounds = array<i64: 1, 2>, scalar_prefetch = 0 : i64, scratch_operands = 0 : i64, tpu.core_type = #tpu.core_type<tc>, window_params = [{transform_indices = @transform_0, window_bounds = array<i64: 1, 2, 128>}, {transform_indices = @transform_1, window_bounds = array<i64: 1, 2, 128>}, {transform_indices = @transform_2, window_bounds = array<i64: 1, 2, 128>}]} {
    %c0 = arith.constant 0 : index
    %c0_0 = arith.constant 0 : index
    %c0_1 = arith.constant 0 : index
    %0 = vector.load %arg2[%c0, %c0_0, %c0_1] : memref<1x2x128xf32, #tpu.memory_space<vmem>>, vector<1x2x128xf32>
    %c0_2 = arith.constant 0 : index
    %c0_3 = arith.constant 0 : index
    %c0_4 = arith.constant 0 : index
    %1 = vector.load %arg3[%c0_2, %c0_3, %c0_4] : memref<1x2x128xf32, #tpu.memory_space<vmem>>, vector<1x2x128xf32>
    %2 = arith.addf %0, %1 : vector<1x2x128xf32>
    %c0_5 = arith.constant 0 : index
    %c0_6 = arith.constant 0 : index
    %c0_7 = arith.constant 0 : index
    %3 = vector.load %arg4[%c0_5, %c0_6, %c0_7] : memref<1x2x128xf32, #tpu.memory_space<vmem>>, vector<1x2x128xf32>
    tpu.vector_store %arg4[%c0_5, %c0_6, %c0_7], %2 {strides = array<i32>} : memref<1x2x128xf32, #tpu.memory_space<vmem>>, vector<1x2x128xf32>,
    return
  }
  func.func @transform_0(%arg0: i32, %arg1: i32) -> (i32, i32, i32) {
    %c0_i32 = arith.constant 0 : i32
    %c0_i32_0 = arith.constant 0 : i32
    return %arg1, %arg0, %c0_i32 : i32, i32, i32
  }
  func.func @transform_1(%arg0: i32, %arg1: i32) -> (i32, i32, i32) {
    %c0_i32 = arith.constant 0 : i32
    %c0_i32_0 = arith.constant 0 : i32
    %c0_i32_1 = arith.constant 0 : i32
    return %c0_i32, %arg0, %c0_i32_0 : i32, i32, i32
  }
  func.func @transform_2(%arg0: i32, %arg1: i32) -> (i32, i32, i32) {
    %c0_i32 = arith.constant 0 : i32
    %c0_i32_0 = arith.constant 0 : i32
    return %arg1, %arg0, %c0_i32 : i32, i32, i32
  }
}

</mosaic_0001>

<bundles_post_ra>
// kernel: tpu_custom_call.1
= control target key start
LH: loop header
LB: loop body
LE: loop exit
PB: predicated region body
PF: predicated region fallthrough
CT: control target
= control target key end

     0   :  { %7 = vsyncpa [#allocation3], 0  ;;  %s689_s0 = inlined_call_operand.hbm [shape: f32[2,2,128], index: 0, kind: input, shape index: {}]   ;;  %s690_s1 = inlined_call_operand.vmem [shape: f32[1,2,128], index: 1, kind: input, shape index: {}]   ;;  %s691_s2 = inlined_call_operand.hbm [shape: f32[2,2,128], index: 2, kind: output, shape index: {}]  }
   0x1   :  { %9 = vsyncpa [#allocation3 + $0x1], 0 }
   0x2   :  { %10 = vsyncpa [#allocation4], 0 }
   0x3   :  { %12 = vsyncpa [#allocation4 + $0x1], 0  ;;  %s514_s9 = smov 0   ;;  %s516_s10 = smov 0  }
   0x4   :  { %s518_s11 = smov 0   ;;  %s520_s12 = smov 0  }
   0x5   :  { %s522_s13 = smov 0   ;;  %s524_s14 = smov 0  }
   0x6 LB: > { %s307_s15 = sadd.s32 4294967295, %s495_s14   ;;  %s308_s16 = sadd.s32 4294967294, %s495_s14   ;;  %s495_s14 = sphi %s524_s14, %s18_s14   ;;  %s491_s13 = sphi %s522_s13, %s707_s13   ;;  %s487_s12 = sphi %s520_s12, %s706_s12   ;;  %s483_s11 = sphi %s518_s11, %s705_s11   ;;  %s479_s10 = sphi %s516_s10, %s704_s10   ;;  %s475_s9 = sphi %s514_s9, %s703_s9  }
   0x7   : > { %s27_s17 = sadd.s32 1, %s491_s13  ;;  %s39_s18 = sadd.s32 1, %s483_s11 }
   0x8   : > { %p28_p0 = scmp.ge.s32.totalorder %s27_s17, 2  ;;  %p46_p1 = scmp.ne.s32.totalorder %s483_s11, %s479_s10 }
   0x9   : > { %p47_p2 = scmp.eq.s32.totalorder %s495_s14, 0  ;;  %p52_p3 = scmp.ne.s32.totalorder %s479_s10, %s475_s9 }
   0xa   : > { %s709_s17 = smov (%p28_p0, %s27_s17), 0  ;;  %p53_p5 = scmp.eq.s32.totalorder %s307_s15, 0 }
   0xb   : > { %p555_p4 = por %p47_p2, %p46_p1  ;;  %s34_s20 = ssub.s32 %s491_s13, %s709_s17 }
   0xc   : > { %p104_p6 = scmp.eq.s32.totalorder %s307_s15, 1  ;;  %p37_p7 = scmp.eq.s32.totalorder %s34_s20, 0 }
   0xd   : > { %p561_p8 = por %p53_p5, %p52_p3  ;;  %p110_p10 = scmp.eq.s32.totalorder %s308_s16, 1 }
   0xe   : > { %p565_p9 = por %p104_p6, %p46_p1  ;;  %p333_p13 = scmp.lt.s32.totalorder %s495_s14, 2 }
   0xf   : > { %s570_s23 = scalar_select %p37_p7, %s483_s11, %s39_s18  }
  0x10   : > { %s695_s22 = scalar_select %p565_p9, 1, 0 }
  0x11   : > { %p572_p11 = por %p110_p10, %p52_p3  ;;  %s137_s25 = sand.u32 1, %s483_s11  }
  0x12   : > { %s312_s26 = sshll.u32 %s137_s25, 1  ;;  %s313_s27 = sshll.u32 %s491_s13, 5 }
  0x13   : > { %s696_s24 = scalar_select %p572_p11, 1, 0 }
  0x14   : > { %s583_s30 = scalar_lea.hbm %s689_s0, %s313_s27  ;;  %s141_s3 = scalar_lea.vmem [#allocation2], %s312_s26 }
  0x15   : > { %s149_s4 = sshll.u32 %s141_s3, 4  ;;  %p589_p0 = pnand %p333_p13, %p555_p4  ;;  %s585_s4 = int_to_ptr.vmem [resolvable:$true] %s149_s4 }
  0x16   : > { %s138_s6 = scalar_lea.sflag [#allocation3], %s137_s25  ;;  %s383_s7 = scalar_lea.hbm %s583_s30, 32 }
  0x17   : > { %p384_p3 = scmp.ne.s32.totalorder %s583_s30, %s383_s7  ;;  %p385_p5 = pneg %p589_p0 }
  0x18   : > { %s388_s16 = scalar_lea.hbm %s689_s0, 64  ;;  %p389_p4 = scmp.lt.u32.totalorder %s583_s30, %s689_s0 }
  0x19   : > { %p386_p6 = pnand %p385_p5, %p384_p3  ;;  %p390_p10 = scmp.lt.u32.totalorder %s388_s16, %s383_s7 }
  0x1a   : > { %p392_p12 = scmp.lt.u32.totalorder %s383_s7, %s583_s30 }
  0x1b   : > { %p387_p7 = pneg %p386_p6  ;;  %p391_p13 = por %p390_p10, %p389_p4 }
  0x1d   : > { %p393_p1 = por %p392_p12, %p391_p13 }
  0x1f   : > { %p394_p2 = pnand %p393_p1, %p387_p7 }
  0x21   : > { %397 = shalt.err (!%p394_p2)
}
  0x22   : > { %s398_s20 = scalar_lea.vmem %s585_s4, 32  ;;  %s497_s25 = smov [#allocation2]  }
  0x23   : > { %p399_p3 = scmp.ne.s32.totalorder %s585_s4, %s398_s20  ;;  %s403_s26 = sshll.u32 %s497_s25, 4  ;;  %s404_s26 = int_to_ptr.vmem [resolvable:$false] %s403_s26 }
  0x24   : > { %s405_s27 = scalar_lea.vmem %s404_s26, 64  ;;  %p406_p9 = scmp.lt.s32.totalorder %s585_s4, %s404_s26 }
  0x25   : > { %p401_p6 = pnand %p399_p3, %p385_p5  ;;  %p407_p4 = scmp.lt.s32.totalorder %s405_s27, %s398_s20 }
  0x27   : > { %p402_p11 = pneg %p401_p6  ;;  %p408_p10 = por %p407_p4, %p406_p9 }
  0x29   : > { %p409_p12 = pnand %p408_p10, %p402_p11 }
  0x2b   : > { %412 = shalt.err (!%p409_p12)
}
  0x2c   : > { %328 = dma.hbm_to_vmem [thread:$0]  (!%p589_p0), %s583_s30, 32, %s585_s4, %s138_s6  }
  0x2d   : > { %p698_p1 = scmp.lt.s32.totalorder %s495_s14, 3  ;;  %p699_p2 = scmp.ge.s32.totalorder %s495_s14, 1 }
  0x2f   : > { %p155_p5 = pnand %p699_p2, %p698_p1 }
  0x30   : > { %s625_s28 = sand.u32 (!%p155_p5), 1, %s479_s10  }
  0x31   : > { %158 = sbr.rel (%p155_p5) target bundleno = 83 (0x53), region = 28  ;;  %s315_s29 = sshll.u32 (!%p155_p5), %s625_s28, 1 }
  0x32   : > { %s161_s3 = scalar_lea.sflag (!%p155_p5), [#allocation3], %s625_s28  ;;  %s164_s7 = scalar_lea.vmem (!%p155_p5), [#allocation2], %s315_s29 }
  0x38   : > { %466 = dma.done.wait (%p561_p8), %s161_s3, 32  }
  0x39   : > { %468 = vsyncadd (%p561_p8), %s161_s3, 4294967264  ;;  %s188_s30 = scalar_lea.vmem [#allocation5], %s315_s29  ;;  %s318_s5 = sshll.u32 %s487_s12, 5  ;;  %v193_v0 = vld [vmem:[%s164_s7] sm:$0x3] }
  0x3a   : > { %s212_s4 = sshll.u32 %s188_s30, 4  ;;  %v194_v1 = vld [vmem:[%s690_s1] sm:$0x3]  ;;  %s642_s21 = scalar_lea.hbm %s691_s2, %s318_s5  ;;  %s637_s4 = int_to_ptr.vmem [resolvable:$true] %s212_s4 }
  0x3b   : > { %v195_v2 = vadd.f32 %v194_v1, %v193_v0  ;;  %s198_s18 = scalar_lea.sflag [#allocation4], %s625_s28  ;;  %s413_s19 = scalar_lea.vmem %s637_s4, 32 }
  0x3c   : > { %p414_p8 = scmp.ne.s32.totalorder %s637_s4, %s413_s19  ;;  %p700_p9 = scmp.ne.s32.totalorder %s695_s22, 0 }
  0x3d   : > { %196 = vst [vmem:[%s188_s30] sm:$0x3] %v195_v2  ;;  %s498_s12 = smov [#allocation5]  }
  0x3e   : > { %p415_p11 = pnand %p414_p8, %p700_p9  ;;  %s417_s20 = sshll.u32 %s498_s12, 4  ;;  %s418_s20 = int_to_ptr.vmem [resolvable:$false] %s417_s20 }
  0x3f   : > { %s419_s25 = scalar_lea.vmem %s418_s20, 64  ;;  %p420_p7 = scmp.lt.s32.totalorder %s637_s4, %s418_s20 }
  0x40   : > { %p416_p0 = pneg %p415_p11  ;;  %p421_p13 = scmp.lt.s32.totalorder %s419_s25, %s413_s19 }
  0x42   : > { %p422_p3 = por %p421_p13, %p420_p7 }
  0x44   : > { %p423_p6 = pnand %p422_p3, %p416_p0 }
  0x46   : > { %426 = shalt.err (!%p423_p6)
}
  0x47   : > { %s427_s26 = scalar_lea.hbm %s642_s21, 32  ;;  %s431_s29 = scalar_lea.hbm %s691_s2, 64 }
  0x48   : > { %p428_p4 = scmp.ne.s32.totalorder %s642_s21, %s427_s26  ;;  %p432_p1 = scmp.lt.u32.totalorder %s642_s21, %s691_s2 }
  0x49   : > { %p433_p2 = scmp.lt.u32.totalorder %s431_s29, %s427_s26  ;;  %p435_p8 = scmp.lt.u32.totalorder %s427_s26, %s642_s21 }
  0x4a   : > { %p429_p10 = pnand %p428_p4, %p700_p9 }
  0x4b   : > { %p434_p5 = por %p433_p2, %p432_p1 }
  0x4c   : > { %p430_p12 = pneg %p429_p10 }
  0x4d   : > { %p436_p11 = por %p435_p8, %p434_p5 }
  0x4f   : > { %p437_p0 = pnand %p436_p11, %p430_p12 }
  0x51   : > { %440 = shalt.err (!%p437_p0)
}
  0x52   : > { %323 = dma.vmem_to_hbm [thread:$0]  (%p700_p9), %s637_s4, 32, %s642_s21, %s198_s18  }
  0x53 PF: > { %s224_s30 = sand.u32 1, %s475_s9   ;;  %p701_p7 = scmp.ne.s32.totalorder %s696_s24, 0 }
  0x54   : > { %p702_p13 = scmp.ge.s32.totalorder %s495_s14, 2  ;;  %s225_s5 = scalar_lea.sflag [#allocation4], %s224_s30 }
  0x56   : > { %p330_p3 = pnand %p702_p13, %p701_p7 }
  0x58   : > { %470 = dma.done.wait (!%p330_p3), %s225_s5, 32  }
  0x59   : > { %472 = vsyncadd (!%p330_p3), %s225_s5, 4294967264  ;;  %s18_s14 = sadd.s32 1, %s495_s14   ;;  %s703_s9 = smov %s479_s10 }
  0x5a   : > { %p15_p6 = scmp.ge.s32.totalorder %s18_s14, 4   ;;  %s704_s10 = smov %s483_s11 }
  0x5b   : > { %s705_s11 = smov %s570_s23  ;;  %s706_s12 = smov %s491_s13 }
  0x5c   : > { %s707_s13 = smov %s709_s17  ;;  %17 = sbr.rel (!%p15_p6) target bundleno = 6 (0x6), region = 76 }
  0x63   :  { %230 = vsyncpa [#allocation3], 1 }
  0x64   :  { %232 = vsyncpa [#allocation3 + $0x1], 1 }
  0x65   :  { %233 = vsyncpa [#allocation4], 1 }
  0x66   :  { %235 = vsyncpa [#allocation4 + $0x1], 1 }

</bundles_post_ra>
